<compile_context>
chip_gen: v7x
topology: tpu7x:2x2x1
jax: 0.10.0
libtpu: 0.0.40
codegen_flags: <defaults>
</compile_context>

<pallas_src>
import math
from functools import partial

import jax
import jax.numpy as jnp
from jax.experimental import pallas as pl
from jax.experimental.pallas import tpu as pltpu


def _round_up(x, m):
    return (x + m - 1) // m * m


def _pick_tile(extent, align, target, prefer_multi):
    """Largest divisor of `extent` that is a multiple of `align` and <= target.

    If `prefer_multi`, prefer the largest such divisor that still yields >= 2
    tiles (so the parallel row axis can shard across both v7x TensorCores).
    """
    best = align
    best_multi = None
    t = align
    limit = min(target, extent)
    while t <= limit:
        if extent % t == 0:
            best = t
            if extent // t >= 2:
                best_multi = t
        t += align
    if prefer_multi and best_multi is not None:
        return best_multi
    return best


# -----------------------------------------------------------------------------
# Kernel 1: support = x @ W   (tiny, done once, stored in the narrow mm dtype)
# -----------------------------------------------------------------------------
def _project_kernel(x_ref, w_ref, s_ref):
    s_ref[...] = jnp.dot(
        x_ref[...], w_ref[...], preferred_element_type=jnp.float32
    ).astype(s_ref.dtype)


# -----------------------------------------------------------------------------
# Kernel 2: acc_i += adj[i, k-tile] @ support[k-tile];  relu + store at the end
# -----------------------------------------------------------------------------
def _aggregate_kernel(adj_ref, s_ref, o_ref, acc_ref, *, apply_relu):
    k = pl.program_id(1)

    @pl.when(k == 0)
    def _init():
        acc_ref[...] = jnp.zeros_like(acc_ref)

    # Both operands are the narrow (bf16) dtype -> MXU, f32 accumulation.
    acc_ref[...] += jnp.dot(adj_ref[...], s_ref[...],
                            preferred_element_type=jnp.float32)

    @pl.when(k == pl.num_programs(1) - 1)
    def _finalize():
        out = acc_ref[...]
        if apply_relu:
            out = jnp.maximum(out, 0.0)        # F.relu (module default act)
        o_ref[...] = out.astype(o_ref.dtype)


def graph_convolution(x, adj, weight, *, apply_relu=True,
                      adj_dtype=jnp.bfloat16,
                      tm_target=512, tk_target=2048):
    """relu(adj @ (x @ weight)) via two Pallas kernels (projection + aggregation).

    x:      (N, F_in)   node features
    adj:    (N, N)      dense adjacency (dense stand-in for torch.spmm's sparse adj)
    weight: (F_in, F_out)
    adj_dtype: dtype used to stream adj / support through the MXU (f32 accumulate).
               bf16 halves the dominant HBM stream; on v7x jnp.float8_e4m3fn is a
               further option for row-normalized adjacencies.
    """
    n, f_in = x.shape
    assert adj.shape == (n, n)
    assert weight.shape[0] == f_in
    f_out = weight.shape[1]
    out_dtype = x.dtype

    # Independent padding of the row dim (sublane, mult of 8) and the reduction
    # dim (lane, mult of 128); tiles are exact divisors -> no lcm blow-up.
    n_pad_m = _round_up(n, 8)
    n_pad_k = _round_up(n, 128)
    tm = _pick_tile(n_pad_m, 8, tm_target, prefer_multi=True)
    tk = _pick_tile(n_pad_k, 128, tk_target, prefer_multi=False)

    # ---- Projection: support = x @ W, computed once, stored as adj_dtype ----
    x_p = jnp.pad(x.astype(jnp.float32), ((0, n_pad_k - n), (0, 0)))
    w32 = weight.astype(jnp.float32)
    support = pl.pallas_call(
        _project_kernel,
        out_shape=jax.ShapeDtypeStruct((n_pad_k, f_out), adj_dtype),
        grid_spec=pltpu.PrefetchScalarGridSpec(
            num_scalar_prefetch=0,
            grid=(n_pad_k // tk,),
            in_specs=[
                pl.BlockSpec((tk, f_in), lambda i: (i, 0)),
                pl.BlockSpec((f_in, f_out), lambda i: (0, 0)),
            ],
            out_specs=pl.BlockSpec((tk, f_out), lambda i: (i, 0)),
        ),
        compiler_params=pltpu.CompilerParams(
            dimension_semantics=("parallel",)),
    )(x_p, w32)

    # Cast + pad adj in a single pass (the cast is the unavoidable HBM pass;
    # reuse this prepared array across layers if adj is shared).
    adj_p = jnp.pad(adj.astype(adj_dtype), ((0, n_pad_m - n), (0, n_pad_k - n)))

    grid = (n_pad_m // tm, n_pad_k // tk)   # (row tiles [parallel], k tiles [arbitrary])

    out = pl.pallas_call(
        partial(_aggregate_kernel, apply_relu=apply_relu),
        out_shape=jax.ShapeDtypeStruct((n_pad_m, f_out), out_dtype),
        grid_spec=pltpu.PrefetchScalarGridSpec(
            num_scalar_prefetch=0,
            grid=grid,
            in_specs=[
                pl.BlockSpec((tm, tk), lambda i, k: (i, k)),      # adj tile (dominant stream)
                pl.BlockSpec((tk, f_out), lambda i, k: (k, 0)),   # support k-tile
            ],
            out_specs=pl.BlockSpec((tm, f_out), lambda i, k: (i, 0)),
            scratch_shapes=[pltpu.VMEM((tm, f_out), jnp.float32)],
        ),
        compiler_params=pltpu.CompilerParams(
            dimension_semantics=("parallel", "arbitrary"),
            # Working set ~4-5 MiB with default tiles; 32 MiB is safe on
            # v5e/v6e (128 MiB physical) and within v7x's 64 MiB.
            vmem_limit_bytes=32 * 1024 * 1024,
        ),
    )(adj_p, support)

    return out[:n]


# -----------------------------------------------------------------------------
if __name__ == "__main__":
    key = jax.random.PRNGKey(0)
    k_x, k_adj, k_w = jax.random.split(key, 3)

    # Small shapes consistent with the module.
    n, in_features, out_features = 16, 32, 16

    x = jax.random.normal(k_x, (n, in_features), jnp.float32)

    # Dense adjacency with self-loops, row-normalized (typical GCN usage).
    a = (jax.random.uniform(k_adj, (n, n)) < 0.3).astype(jnp.float32)
    a = jnp.clip(a + jnp.eye(n, dtype=jnp.float32), 0.0, 1.0)
    adj = a / jnp.sum(a, axis=1, keepdims=True)

    # torch.nn.init.xavier_uniform_ equivalent for the (F_in, F_out) weight.
    bound = math.sqrt(6.0 / (in_features + out_features))
    weight = jax.random.uniform(k_w, (in_features, out_features), jnp.float32,
                                -bound, bound)

    out = jax.block_until_ready(graph_convolution(x, adj, weight))

    ref = jnp.maximum(
        jnp.matmul(adj, jnp.matmul(x, weight, precision="highest"),
                   precision="highest"), 0.0)
    assert out.shape == (n, out_features)
    assert bool(jnp.all(jnp.isfinite(out)))
    assert bool(jnp.allclose(out, ref, atol=2e-2, rtol=2e-2))

    # Exercise the multi-block grid path with a non-aligned node count.
    n2 = 1030
    k_x2, k_adj2 = jax.random.split(jax.random.PRNGKey(1))
    x2 = jax.random.normal(k_x2, (n2, in_features), jnp.float32)
    a2 = (jax.random.uniform(k_adj2, (n2, n2)) < 0.01).astype(jnp.float32)
    a2 = jnp.clip(a2 + jnp.eye(n2, dtype=jnp.float32), 0.0, 1.0)
    adj2 = a2 / jnp.sum(a2, axis=1, keepdims=True)

    out2 = jax.block_until_ready(graph_convolution(x2, adj2, weight))
    ref2 = jnp.maximum(
        jnp.matmul(adj2, jnp.matmul(x2, weight, precision="highest"),
                   precision="highest"), 0.0)
    assert out2.shape == (n2, out_features)
    assert bool(jnp.all(jnp.isfinite(out2)))
    assert bool(jnp.allclose(out2, ref2, atol=2e-2, rtol=2e-2))

    print("KERNEL_OK")
</pallas_src>

<mosaic_0001>
module attributes {stable_mosaic.version = 11 : i64} {
  func.func @_project_kernel(%arg0: i32, %arg1: memref<128x32xf32, #tpu.memory_space<vmem>>, %arg2: memref<32x16xf32, #tpu.memory_space<vmem>>, %arg3: memref<128x16xbf16, #tpu.memory_space<vmem>>) attributes {dimension_semantics = [#tpu.dimension_semantics<parallel>], iteration_bounds = array<i64: 1>, scalar_prefetch = 0 : i64, scratch_operands = 0 : i64, tpu.core_type = #tpu.core_type<tc>, window_params = [{transform_indices = @transform_0, window_bounds = array<i64: 128, 32>}, {pipeline_mode = #tpu.pipeline_mode<synchronous>, transform_indices = @transform_1, window_bounds = array<i64: 32, 16>}, {transform_indices = @transform_2, window_bounds = array<i64: 128, 16>}]} {
    %c0 = arith.constant 0 : index
    %c0_0 = arith.constant 0 : index
    %0 = vector.load %arg1[%c0, %c0_0] : memref<128x32xf32, #tpu.memory_space<vmem>>, vector<128x32xf32>
    %c0_1 = arith.constant 0 : index
    %c0_2 = arith.constant 0 : index
    %1 = vector.load %arg2[%c0_1, %c0_2] : memref<32x16xf32, #tpu.memory_space<vmem>>, vector<32x16xf32>
    %cst = arith.constant dense<0.000000e+00> : vector<128x16xf32>
    %2 = tpu.matmul %0, %1, %cst {dimension_numbers = #tpu.dot_dimension_numbers<[1], [0], [0], [1], [0, 0, 1, 1], [], []>} : vector<128x32xf32>, vector<32x16xf32>, vector<128x16xf32> -> vector<128x16xf32>
    %3 = arith.truncf %2 : vector<128x16xf32> to vector<128x16xbf16>
    %c0_3 = arith.constant 0 : index
    %c0_4 = arith.constant 0 : index
    %4 = vector.load %arg3[%c0_3, %c0_4] : memref<128x16xbf16, #tpu.memory_space<vmem>>, vector<128x16xbf16>
    tpu.vector_store %arg3[%c0_3, %c0_4], %3 {strides = array<i32>} : memref<128x16xbf16, #tpu.memory_space<vmem>>, vector<128x16xbf16>,
    return
  }
  func.func @transform_0(%arg0: i32) -> (i32, i32) {
    %c0_i32 = arith.constant 0 : i32
    %c0_i32_0 = arith.constant 0 : i32
    return %arg0, %c0_i32 : i32, i32
  }
  func.func @transform_1(%arg0: i32) -> (i32, i32) {
    %c0_i32 = arith.constant 0 : i32
    %c0_i32_0 = arith.constant 0 : i32
    %c0_i32_1 = arith.constant 0 : i32
    return %c0_i32, %c0_i32_0 : i32, i32
  }
  func.func @transform_2(%arg0: i32) -> (i32, i32) {
    %c0_i32 = arith.constant 0 : i32
    %c0_i32_0 = arith.constant 0 : i32
    return %arg0, %c0_i32 : i32, i32
  }
}

</mosaic_0001>

<bundles_post_ra>
// kernel: tpu_custom_call.1
= control target key start
LH: loop header
LB: loop body
LE: loop exit
PB: predicated region body
PF: predicated region fallthrough
CT: control target
= control target key end

     0   :  { %vm31_vm0 = vcmask 261120   ;;  %vm289_vm1 = vcmask 125952   ;;  %s577_s1 = inlined_call_operand.vmem [shape: f32[32,16], index: 1, kind: input, shape index: {}]   ;;  %s578_s0 = inlined_call_operand.vmem [shape: f32[128,32], index: 0, kind: input, shape index: {}]   ;;  %s579_s2 = inlined_call_operand.vmem [shape: bf16[128,16], index: 2, kind: output, shape index: {}]  }
   0x1   :  { %v27_v0 = vld [vmem:[%s577_s1] sm:$0xff]  ;;  %v28_v1 = vld [vmem:[%s577_s1 + $0x8] sm:$0xff]  ;;  %v29_v2 = vld [vmem:[%s577_s1 + $0x10] sm:$0xff] }
   0x2   :  { %v410_v3 = vpack.c.bf16 %v28_v1, %v27_v0  ;;  %v30_v4 = vld [vmem:[%s577_s1 + $0x18] sm:$0xff]  ;;  %v11_v5 = vld [vmem:[%s578_s0] sm:$0xff]  ;;  %v12_v8 = vld [vmem:[%s578_s0 + $0x8] sm:$0xff] }
   0x3   :  { %v19_v6 = vld [vmem:[%s578_s0 + $0x40] sm:$0xff]  ;;  %v414_v7 = vpack.c.bf16 %v30_v4, %v29_v2  ;;  %386 = vmatprep.mubr.msk.f32.mxu0 %vm31_vm0, %v11_v5  ;;  %v20_v9 = vld [vmem:[%s578_s0 + $0x48] sm:$0xff]  ;;  %v13_v10 = vld [vmem:[%s578_s0 + $0x10] sm:$0xff] }
   0x4   :  { %398 = vmatprep.mubr.msk.f32.mxu1 %vm31_vm0, %v19_v6  ;;  %411 = vmatprep.subr.bf16.mxu0 %v410_v3  ;;  %v21_v11 = vld [vmem:[%s578_s0 + $0x50] sm:$0xff]  ;;  %v14_v12 = vld [vmem:[%s578_s0 + $0x18] sm:$0xff]  ;;  %v15_v14 = vld [vmem:[%s578_s0 + $0x20] sm:$0xff] }
   0x5   :  { %418 = vmatprep.subr.bf16.mxu1 %v410_v3  ;;  %413 = vmatpush3.bf16.msra.mxu0 %v410_v3  ;;  %v22_v13 = vld [vmem:[%s578_s0 + $0x58] sm:$0xff]  ;;  %v23_v15 = vld [vmem:[%s578_s0 + $0x60] sm:$0xff]  ;;  %v16_v16 = vld [vmem:[%s578_s0 + $0x28] sm:$0xff] }
   0x6   :  { %420 = vmatpush3.bf16.msra.mxu1 %v410_v3  ;;  %415 = vmatprep.subr.bf16.mxu0 %v414_v7  ;;  %v24_v17 = vld [vmem:[%s578_s0 + $0x68] sm:$0xff]  ;;  %v17_v18 = vld [vmem:[%s578_s0 + $0x30] sm:$0xff]  ;;  %v18_v20 = vld [vmem:[%s578_s0 + $0x38] sm:$0xff] }
   0x7   :  { %419 = vmatprep.subr.bf16.mxu1 %v414_v7  ;;  %v25_v19 = vld [vmem:[%s578_s0 + $0x70] sm:$0xff]  ;;  %v26_v21 = vld [vmem:[%s578_s0 + $0x78] sm:$0xff] }
   0x9   :  { %417 = vmatpush3.bf16.msra.mxu0 %v414_v7 }
   0xa   :  { %421 = vmatpush3.bf16.msra.mxu1 %v414_v7 }
   0xc   :  { %387 = vmatmul.mubr.msk.f32.vlgmr.msra.gmra.mrb[0].mxu0 %vm31_vm0, %v12_v8 }
   0xd   :  { %399 = vmatmul.mubr.msk.f32.vlgmr.msra.gmra.mrb[0].mxu1 %vm31_vm0, %v20_v9  ;;  %389 = vmatprep.mubr.msk.f32.mxu0 %vm31_vm0, %v13_v10 }
   0xe   :  { %401 = vmatprep.mubr.msk.f32.mxu1 %vm31_vm0, %v21_v11 }
  0x10   :  { %390 = vmatmul.mubr.msk.f32.gmra.mrb[2].mxu0 %vm31_vm0, %v14_v12 }
  0x11   :  { %402 = vmatmul.mubr.msk.f32.gmra.mrb[2].mxu1 %vm31_vm0, %v22_v13  ;;  %392 = vmatprep.mubr.msk.f32.mxu0 %vm31_vm0, %v15_v14 }
  0x12   :  { %404 = vmatprep.mubr.msk.f32.mxu1 %vm31_vm0, %v23_v15 }
  0x14   :  { %393 = vmatmul.mubr.msk.f32.gmra.mrb[4].mxu0 %vm31_vm0, %v16_v16 }
  0x15   :  { %405 = vmatmul.mubr.msk.f32.gmra.mrb[4].mxu1 %vm31_vm0, %v24_v17  ;;  %395 = vmatprep.mubr.msk.f32.mxu0 %vm31_vm0, %v17_v18 }
  0x16   :  { %407 = vmatprep.mubr.msk.f32.mxu1 %vm31_vm0, %v25_v19 }
  0x18   :  { %396 = vmatmul.mubr.msk.f32.gmra.mrb[6].mxu0 %vm31_vm0, %v18_v20 }
  0x19   :  { %408 = vmatmul.mubr.msk.f32.gmra.mrb[6].mxu1 %vm31_vm0, %v26_v21 }
  0xdf   :  { %v388_v22 = vpop.f32.mrb[0].mxu0 }
  0xe0   :  { %v400_v23 = vpop.f32.mrb[0].mxu1  ;;  %v343_v24 = vpack.c.bf16 %v388_v22, %v388_v22  ;;  %v146_v26 = vpop.f32.mrb[1].mxu0 }
  0xe1   :  { %v351_v25 = vpack.c.bf16 %v400_v23, %v400_v23  ;;  %v186_v27 = vpop.f32.mrb[1].mxu1  ;;  %v342_v28 = vpack.c.bf16 %v146_v26, %v146_v26 }
  0xe2   :  { %v350_v29 = vpack.c.bf16 %v186_v27, %v186_v27  ;;  %291 = vst.msk [vmem:[%s579_s2 + $0x4] sm:$0xf] %vm289_vm1, %v343_v24 }
  0xe3   :  { %299 = vst.msk [vmem:[%s579_s2 + $0x24] sm:$0xf] %vm289_vm1, %v351_v25  ;;  %290 = vst.msk [vmem:[%s579_s2] sm:$0xf] %vm289_vm1, %v342_v28  ;;  %v391_v30 = vpop.f32.mrb[2].mxu0 }
  0xe4   :  { %298 = vst.msk [vmem:[%s579_s2 + $0x20] sm:$0xf] %vm289_vm1, %v350_v29  ;;  %v403_v31 = vpop.f32.mrb[2].mxu1  ;;  %v345_v32 = vpack.c.bf16 %v391_v30, %v391_v30  ;;  %v156_v34 = vpop.f32.mrb[3].mxu0 }
  0xe5   :  { %v353_v33 = vpack.c.bf16 %v403_v31, %v403_v31  ;;  %v196_v35 = vpop.f32.mrb[3].mxu1  ;;  %v344_v36 = vpack.c.bf16 %v156_v34, %v156_v34 }
  0xe6   :  { %v352_v37 = vpack.c.bf16 %v196_v35, %v196_v35  ;;  %293 = vst.msk [vmem:[%s579_s2 + $0xc] sm:$0xf] %vm289_vm1, %v345_v32 }
  0xe7   :  { %301 = vst.msk [vmem:[%s579_s2 + $0x2c] sm:$0xf] %vm289_vm1, %v353_v33  ;;  %292 = vst.msk [vmem:[%s579_s2 + $0x8] sm:$0xf] %vm289_vm1, %v344_v36  ;;  %v394_v38 = vpop.f32.mrb[4].mxu0 }
  0xe8   :  { %300 = vst.msk [vmem:[%s579_s2 + $0x28] sm:$0xf] %vm289_vm1, %v352_v37  ;;  %v406_v39 = vpop.f32.mrb[4].mxu1  ;;  %v347_v40 = vpack.c.bf16 %v394_v38, %v394_v38  ;;  %v166_v42 = vpop.f32.mrb[5].mxu0 }
  0xe9   :  { %v355_v41 = vpack.c.bf16 %v406_v39, %v406_v39  ;;  %v206_v43 = vpop.f32.mrb[5].mxu1  ;;  %v346_v44 = vpack.c.bf16 %v166_v42, %v166_v42 }
  0xea   :  { %v354_v45 = vpack.c.bf16 %v206_v43, %v206_v43  ;;  %295 = vst.msk [vmem:[%s579_s2 + $0x14] sm:$0xf] %vm289_vm1, %v347_v40 }
  0xeb   :  { %303 = vst.msk [vmem:[%s579_s2 + $0x34] sm:$0xf] %vm289_vm1, %v355_v41  ;;  %294 = vst.msk [vmem:[%s579_s2 + $0x10] sm:$0xf] %vm289_vm1, %v346_v44  ;;  %v397_v46 = vpop.f32.mrb[6].mxu0 }
  0xec   :  { %302 = vst.msk [vmem:[%s579_s2 + $0x30] sm:$0xf] %vm289_vm1, %v354_v45  ;;  %v409_v47 = vpop.f32.mrb[6].mxu1  ;;  %v349_v48 = vpack.c.bf16 %v397_v46, %v397_v46  ;;  %v176_v50 = vpop.f32.mrb[7].mxu0 }
  0xed   :  { %v357_v49 = vpack.c.bf16 %v409_v47, %v409_v47  ;;  %v216_v51 = vpop.f32.mrb[7].mxu1  ;;  %v348_v52 = vpack.c.bf16 %v176_v50, %v176_v50 }
  0xee   :  { %v356_v53 = vpack.c.bf16 %v216_v51, %v216_v51  ;;  %297 = vst.msk [vmem:[%s579_s2 + $0x1c] sm:$0xf] %vm289_vm1, %v349_v48 }
  0xef   :  { %305 = vst.msk [vmem:[%s579_s2 + $0x3c] sm:$0xf] %vm289_vm1, %v357_v49  ;;  %296 = vst.msk [vmem:[%s579_s2 + $0x18] sm:$0xf] %vm289_vm1, %v348_v52 }
  0xf0   :  { %304 = vst.msk [vmem:[%s579_s2 + $0x38] sm:$0xf] %vm289_vm1, %v356_v53 }

</bundles_post_ra>
